<compile_context>
chip_gen: v7x
topology: tpu7x:2x2x1
jax: 0.10.0
libtpu: 0.0.40
codegen_flags: <defaults>
</compile_context>

<pallas_src>
import functools
import math

import jax
import jax.numpy as jnp
from jax.experimental import pallas as pl
from jax.experimental.pallas import tpu as pltpu


# ----------------------------------------------------------------------------
# Kernel: one batch tile through the full fused MLP.
# ----------------------------------------------------------------------------
def _mlp_kernel(x_ref,
                w1_ref, b1_ref,
                w2_ref, b2_ref,
                w3_ref, b3_ref,
                w4_ref, b4_ref,
                w5_ref, b5_ref,
                o_ref):
    h = x_ref[...]  # (TB, 500), f32 (or bf16 if the caller streamed bf16)

    def layer(h, w_ref, b_ref):
        # bf16 operands on the MXU, f32 accumulation; bias + ReLU in f32.
        acc = jnp.dot(h.astype(jnp.bfloat16), w_ref[...],
                      preferred_element_type=jnp.float32)
        return jnp.maximum(acc + b_ref[...], 0.0)

    h = layer(h, w1_ref, b1_ref)   # (TB, 512)
    h = layer(h, w2_ref, b2_ref)   # (TB, 256)
    h = layer(h, w3_ref, b3_ref)   # (TB, 128)
    h = layer(h, w4_ref, b4_ref)   # (TB, 64)

    # 64 -> 1 head off the MXU: VPU multiply + cross-lane (XLU) reduction.
    logits = jnp.sum(h * w5_ref[...], axis=-1, keepdims=True) + b5_ref[...]
    o_ref[...] = jax.nn.sigmoid(logits).astype(o_ref.dtype)


def _round_up(x, m):
    return (x + m - 1) // m * m


# ----------------------------------------------------------------------------
# One-time parameter preparation (do NOT call per forward pass):
#   hidden layers -> bf16 weights + (1, N) f32 biases (BN already folded),
#   head          -> (1, 64) f32 weight row + (1, 1) f32 bias.
# ----------------------------------------------------------------------------
def prepare_params(params):
    prepared = []
    for w, b in params[:-1]:
        prepared.append((jnp.asarray(w, jnp.bfloat16),
                         jnp.asarray(b, jnp.float32).reshape(1, -1)))
    w5, b5 = params[-1]
    prepared.append((jnp.asarray(w5, jnp.float32).reshape(1, -1),
                     jnp.asarray(b5, jnp.float32).reshape(1, 1)))
    return prepared


@functools.partial(jax.jit, static_argnames=("block_batch",))
def feedforward_forward(x, prepared_params, *, block_batch=512):
    """Run the fused MLP Pallas kernel.

    Args:
      x: (batch, 500) float32 (or bfloat16) input.
      prepared_params: output of prepare_params() (bf16 weights, f32 biases,
        eval-mode BatchNorm already folded).
      block_batch: max rows per batch tile.  512 default; 1024 is a good
        v6e/v7x choice (vmem_limit is raised to 32 MiB so it fits on v5e too).
    Returns:
      (batch, 1) float32 probabilities.
    """
    batch, in_dim = x.shape

    # Tile selection: multiple of 8 rows; for small batches split into >= 2
    # tiles so both v7x TensorCores get work.
    tb = min(_round_up(block_batch, 8), _round_up(pl.cdiv(batch, 2), 8))
    tb = max(tb, 8)
    grid = (pl.cdiv(batch, tb),)

    kernel_args = [x]
    # Full (ragged) 500-wide last dim: legal because it equals the array dim.
    in_specs = [pl.BlockSpec((tb, in_dim), lambda i: (i, 0))]

    for w, b in prepared_params[:-1]:
        kernel_args += [w, b]
        in_specs += [pl.BlockSpec(w.shape, lambda i: (0, 0)),   # VMEM-resident
                     pl.BlockSpec(b.shape, lambda i: (0, 0))]
    w5, b5 = prepared_params[-1]
    kernel_args += [w5, b5]
    in_specs += [pl.BlockSpec(w5.shape, lambda i: (0, 0)),
                 pl.BlockSpec(b5.shape, lambda i: (0, 0))]

    dims = [in_dim] + [int(w.shape[1]) for w, _ in prepared_params[:-1]] + [1]
    flops = 2 * batch * sum(a * b for a, b in zip(dims[:-1], dims[1:]))
    bytes_accessed = (x.size * x.dtype.itemsize + batch * 4 +
                      sum(int(a.size) * a.dtype.itemsize
                          for a in kernel_args[1:]))

    return pl.pallas_call(
        _mlp_kernel,
        out_shape=jax.ShapeDtypeStruct((batch, 1), jnp.float32),
        grid=grid,
        in_specs=in_specs,
        out_specs=pl.BlockSpec((tb, 1), lambda i: (i, 0)),
        compiler_params=pltpu.CompilerParams(
            dimension_semantics=("parallel",),
            vmem_limit_bytes=32 * 1024 * 1024),
        cost_estimate=pl.CostEstimate(
            flops=flops,
            transcendentals=2 * batch,   # sigmoid ~ exp + reciprocal per row
            bytes_accessed=bytes_accessed),
    )(*kernel_args)


# ----------------------------------------------------------------------------
# Deterministic parameter init (mirrors _initialize_weights) + eval-mode BN fold:
#   Linear: Xavier uniform weights, zero bias.
#   BN: gamma=1, beta=0, mean=0, var=1, eps=1e-5 ->
#   y = x @ (W * s) + (b * s + t),  s = gamma/sqrt(var+eps), t = beta - mean*s
# ----------------------------------------------------------------------------
def init_params(key, input_dim=500, hidden_dims=(512, 256, 128, 64)):
    dims = [input_dim] + list(hidden_dims) + [1]
    eps = 1e-5
    params = []
    for i in range(len(dims) - 1):
        fan_in, fan_out = dims[i], dims[i + 1]
        key, sub = jax.random.split(key)
        limit = math.sqrt(6.0 / (fan_in + fan_out))
        w = jax.random.uniform(sub, (fan_in, fan_out), jnp.float32, -limit, limit)
        b = jnp.zeros((1, fan_out), jnp.float32)
        if i < len(hidden_dims):  # fold eval-mode BatchNorm into the Linear
            gamma = jnp.ones((fan_out,), jnp.float32)
            beta = jnp.zeros((fan_out,), jnp.float32)
            running_mean = jnp.zeros((fan_out,), jnp.float32)
            running_var = jnp.ones((fan_out,), jnp.float32)
            s = gamma / jnp.sqrt(running_var + eps)
            t = beta - running_mean * s
            w = w * s[None, :]
            b = b * s[None, :] + t[None, :]
        params.append((w, b))
    return params


def reference_forward(x, params, weight_dtype=jnp.float32):
    """Pure-JAX reference. weight_dtype=bf16 mimics the kernel's quantization."""
    h = x.astype(jnp.float32)
    n = len(params)
    for i, (w, b) in enumerate(params):
        if i < n - 1:
            h = jnp.dot(h.astype(weight_dtype), w.astype(weight_dtype),
                        preferred_element_type=jnp.float32) + b.reshape(1, -1)
            h = jnp.maximum(h, 0.0)
        else:
            h = jnp.dot(h, w, preferred_element_type=jnp.float32) + b.reshape(1, -1)
    return jax.nn.sigmoid(h)


if __name__ == "__main__":
    key = jax.random.PRNGKey(0)
    key, xkey = jax.random.split(key)

    input_dim = 500
    params = init_params(key, input_dim=input_dim)
    prepared = prepare_params(params)   # one-time bf16 cast / reshape

    # Small single-tile case.
    x_small = jax.random.normal(xkey, (8, input_dim), jnp.float32)
    out_small = jax.block_until_ready(feedforward_forward(x_small, prepared))

    # Multi-tile, ragged batch case (exercises grid + partial last tile).
    key, xkey2 = jax.random.split(key)
    x_big = jax.random.normal(xkey2, (300, input_dim), jnp.float32)
    out_big = jax.block_until_ready(
        feedforward_forward(x_big, prepared, block_batch=128))

    for x, out in ((x_small, out_small), (x_big, out_big)):
        assert out.shape == (x.shape[0], 1), out.shape
        ref_bf16 = reference_forward(x, params, weight_dtype=jnp.bfloat16)
        ref_f32 = reference_forward(x, params, weight_dtype=jnp.float32)
        assert jnp.allclose(out, ref_bf16, atol=1e-3, rtol=1e-3), (
            float(jnp.max(jnp.abs(out - ref_bf16))))
        assert jnp.allclose(out, ref_f32, atol=5e-2, rtol=5e-2), (
            float(jnp.max(jnp.abs(out - ref_f32))))

    print("KERNEL_OK")
</pallas_src>

<mosaic_0001>
module attributes {stable_mosaic.version = 11 : i64} {
  func.func @_mlp_kernel(%arg0: i32, %arg1: memref<8x500xf32, #tpu.memory_space<vmem>>, %arg2: memref<500x512xbf16, #tpu.memory_space<vmem>>, %arg3: memref<1x512xf32, #tpu.memory_space<vmem>>, %arg4: memref<512x256xbf16, #tpu.memory_space<vmem>>, %arg5: memref<1x256xf32, #tpu.memory_space<vmem>>, %arg6: memref<256x128xbf16, #tpu.memory_space<vmem>>, %arg7: memref<1x128xf32, #tpu.memory_space<vmem>>, %arg8: memref<128x64xbf16, #tpu.memory_space<vmem>>, %arg9: memref<1x64xf32, #tpu.memory_space<vmem>>, %arg10: memref<1x64xf32, #tpu.memory_space<vmem>>, %arg11: memref<1x1xf32, #tpu.memory_space<vmem>>, %arg12: memref<8x1xf32, #tpu.memory_space<vmem>>) attributes {dimension_semantics = [#tpu.dimension_semantics<parallel>], iteration_bounds = array<i64: 1>, scalar_prefetch = 0 : i64, scratch_operands = 0 : i64, tpu.core_type = #tpu.core_type<tc>, window_params = [{transform_indices = @transform_0, window_bounds = array<i64: 8, 500>}, {pipeline_mode = #tpu.pipeline_mode<synchronous>, transform_indices = @transform_1, window_bounds = array<i64: 500, 512>}, {pipeline_mode = #tpu.pipeline_mode<synchronous>, transform_indices = @transform_2, window_bounds = array<i64: 1, 512>}, {pipeline_mode = #tpu.pipeline_mode<synchronous>, transform_indices = @transform_3, window_bounds = array<i64: 512, 256>}, {pipeline_mode = #tpu.pipeline_mode<synchronous>, transform_indices = @transform_4, window_bounds = array<i64: 1, 256>}, {pipeline_mode = #tpu.pipeline_mode<synchronous>, transform_indices = @transform_5, window_bounds = array<i64: 256, 128>}, {pipeline_mode = #tpu.pipeline_mode<synchronous>, transform_indices = @transform_6, window_bounds = array<i64: 1, 128>}, {pipeline_mode = #tpu.pipeline_mode<synchronous>, transform_indices = @transform_7, window_bounds = array<i64: 128, 64>}, {pipeline_mode = #tpu.pipeline_mode<synchronous>, transform_indices = @transform_8, window_bounds = array<i64: 1, 64>}, {pipeline_mode = #tpu.pipeline_mode<synchronous>, transform_indices = @transform_9, window_bounds = array<i64: 1, 64>}, {pipeline_mode = #tpu.pipeline_mode<synchronous>, transform_indices = @transform_10, window_bounds = array<i64: 1, 1>}, {transform_indices = @transform_11, window_bounds = array<i64: 8, 1>}]} {
    %c0 = arith.constant 0 : index
    %c0_0 = arith.constant 0 : index
    %0 = vector.load %arg1[%c0, %c0_0] : memref<8x500xf32, #tpu.memory_space<vmem>>, vector<8x500xf32>
    %1 = arith.truncf %0 : vector<8x500xf32> to vector<8x500xbf16>
    %c0_1 = arith.constant 0 : index
    %c0_2 = arith.constant 0 : index
    %2 = vector.load %arg2[%c0_1, %c0_2] : memref<500x512xbf16, #tpu.memory_space<vmem>>, vector<500x512xbf16>
    %cst = arith.constant dense<0.000000e+00> : vector<8x512xf32>
    %3 = tpu.matmul %1, %2, %cst {dimension_numbers = #tpu.dot_dimension_numbers<[1], [0], [0], [1], [0, 0, 1, 1], [], []>} : vector<8x500xbf16>, vector<500x512xbf16>, vector<8x512xf32> -> vector<8x512xf32>
    %c0_3 = arith.constant 0 : index
    %c0_4 = arith.constant 0 : index
    %4 = vector.load %arg3[%c0_3, %c0_4] : memref<1x512xf32, #tpu.memory_space<vmem>>, vector<1x512xf32>
    %5 = vector.broadcast %4 : vector<1x512xf32> to vector<8x512xf32>
    %6 = arith.addf %3, %5 : vector<8x512xf32>
    %cst_5 = arith.constant 0.000000e+00 : f32
    %7 = vector.broadcast %cst_5 : f32 to vector<8x512xf32>
    %8 = arith.maximumf %6, %7 : vector<8x512xf32>
    %9 = arith.truncf %8 : vector<8x512xf32> to vector<8x512xbf16>
    %c0_6 = arith.constant 0 : index
    %c0_7 = arith.constant 0 : index
    %10 = vector.load %arg4[%c0_6, %c0_7] : memref<512x256xbf16, #tpu.memory_space<vmem>>, vector<512x256xbf16>
    %cst_8 = arith.constant dense<0.000000e+00> : vector<8x256xf32>
    %11 = tpu.matmul %9, %10, %cst_8 {dimension_numbers = #tpu.dot_dimension_numbers<[1], [0], [0], [1], [0, 0, 1, 1], [], []>} : vector<8x512xbf16>, vector<512x256xbf16>, vector<8x256xf32> -> vector<8x256xf32>
    %c0_9 = arith.constant 0 : index
    %c0_10 = arith.constant 0 : index
    %12 = vector.load %arg5[%c0_9, %c0_10] : memref<1x256xf32, #tpu.memory_space<vmem>>, vector<1x256xf32>
    %13 = vector.broadcast %12 : vector<1x256xf32> to vector<8x256xf32>
    %14 = arith.addf %11, %13 : vector<8x256xf32>
    %cst_11 = arith.constant 0.000000e+00 : f32
    %15 = vector.broadcast %cst_11 : f32 to vector<8x256xf32>
    %16 = arith.maximumf %14, %15 : vector<8x256xf32>
    %17 = arith.truncf %16 : vector<8x256xf32> to vector<8x256xbf16>
    %c0_12 = arith.constant 0 : index
    %c0_13 = arith.constant 0 : index
    %18 = vector.load %arg6[%c0_12, %c0_13] : memref<256x128xbf16, #tpu.memory_space<vmem>>, vector<256x128xbf16>
    %cst_14 = arith.constant dense<0.000000e+00> : vector<8x128xf32>
    %19 = tpu.matmul %17, %18, %cst_14 {dimension_numbers = #tpu.dot_dimension_numbers<[1], [0], [0], [1], [0, 0, 1, 1], [], []>} : vector<8x256xbf16>, vector<256x128xbf16>, vector<8x128xf32> -> vector<8x128xf32>
    %c0_15 = arith.constant 0 : index
    %c0_16 = arith.constant 0 : index
    %20 = vector.load %arg7[%c0_15, %c0_16] : memref<1x128xf32, #tpu.memory_space<vmem>>, vector<1x128xf32>
    %21 = vector.broadcast %20 : vector<1x128xf32> to vector<8x128xf32>
    %22 = arith.addf %19, %21 : vector<8x128xf32>
    %cst_17 = arith.constant 0.000000e+00 : f32
    %23 = vector.broadcast %cst_17 : f32 to vector<8x128xf32>
    %24 = arith.maximumf %22, %23 : vector<8x128xf32>
    %25 = arith.truncf %24 : vector<8x128xf32> to vector<8x128xbf16>
    %c0_18 = arith.constant 0 : index
    %c0_19 = arith.constant 0 : index
    %26 = vector.load %arg8[%c0_18, %c0_19] : memref<128x64xbf16, #tpu.memory_space<vmem>>, vector<128x64xbf16>
    %cst_20 = arith.constant dense<0.000000e+00> : vector<8x64xf32>
    %27 = tpu.matmul %25, %26, %cst_20 {dimension_numbers = #tpu.dot_dimension_numbers<[1], [0], [0], [1], [0, 0, 1, 1], [], []>} : vector<8x128xbf16>, vector<128x64xbf16>, vector<8x64xf32> -> vector<8x64xf32>
    %c0_21 = arith.constant 0 : index
    %c0_22 = arith.constant 0 : index
    %28 = vector.load %arg9[%c0_21, %c0_22] : memref<1x64xf32, #tpu.memory_space<vmem>>, vector<1x64xf32>
    %29 = vector.broadcast %28 : vector<1x64xf32> to vector<8x64xf32>
    %30 = arith.addf %27, %29 : vector<8x64xf32>
    %cst_23 = arith.constant 0.000000e+00 : f32
    %31 = vector.broadcast %cst_23 : f32 to vector<8x64xf32>
    %32 = arith.maximumf %30, %31 : vector<8x64xf32>
    %c0_24 = arith.constant 0 : index
    %c0_25 = arith.constant 0 : index
    %33 = vector.load %arg10[%c0_24, %c0_25] : memref<1x64xf32, #tpu.memory_space<vmem>>, vector<1x64xf32>
    %34 = vector.broadcast %33 : vector<1x64xf32> to vector<8x64xf32>
    %35 = arith.mulf %32, %34 : vector<8x64xf32>
    %cst_26 = arith.constant dense<0.000000e+00> : vector<8xf32>
    %36 = vector.multi_reduction <add>, %35, %cst_26 [1] : vector<8x64xf32> to vector<8xf32>
    %37 = vector.shape_cast %36 : vector<8xf32> to vector<8x1xf32>
    %c0_27 = arith.constant 0 : index
    %c0_28 = arith.constant 0 : index
    %38 = vector.load %arg11[%c0_27, %c0_28] : memref<1x1xf32, #tpu.memory_space<vmem>>, vector<1x1xf32>
    %39 = vector.broadcast %38 : vector<1x1xf32> to vector<8x1xf32>
    %40 = arith.addf %37, %39 : vector<8x1xf32>
    %41 = arith.negf %40 : vector<8x1xf32>
    %42 = math.exp %41 : vector<8x1xf32>
    %cst_29 = arith.constant 1.000000e+00 : f32
    %43 = vector.broadcast %cst_29 : f32 to vector<8x1xf32>
    %44 = arith.addf %43, %42 : vector<8x1xf32>
    %45 = arith.divf %43, %44 : vector<8x1xf32>
    %c0_30 = arith.constant 0 : index
    %c0_31 = arith.constant 0 : index
    %46 = vector.load %arg12[%c0_30, %c0_31] : memref<8x1xf32, #tpu.memory_space<vmem>>, vector<8x1xf32>
    tpu.vector_store %arg12[%c0_30, %c0_31], %45 {strides = array<i32>} : memref<8x1xf32, #tpu.memory_space<vmem>>, vector<8x1xf32>,
    return
  }
  func.func @transform_0(%arg0: i32) -> (i32, i32) {
    %c0_i32 = arith.constant 0 : i32
    %c0_i32_0 = arith.constant 0 : i32
    return %arg0, %c0_i32 : i32, i32
  }
  func.func @transform_1(%arg0: i32) -> (i32, i32) {
    %c0_i32 = arith.constant 0 : i32
    %c0_i32_0 = arith.constant 0 : i32
    %c0_i32_1 = arith.constant 0 : i32
    return %c0_i32, %c0_i32_0 : i32, i32
  }
  func.func @transform_2(%arg0: i32) -> (i32, i32) {
    %c0_i32 = arith.constant 0 : i32
    %c0_i32_0 = arith.constant 0 : i32
    %c0_i32_1 = arith.constant 0 : i32
    return %c0_i32, %c0_i32_0 : i32, i32
  }
  func.func @transform_3(%arg0: i32) -> (i32, i32) {
    %c0_i32 = arith.constant 0 : i32
    %c0_i32_0 = arith.constant 0 : i32
    %c0_i32_1 = arith.constant 0 : i32
    return %c0_i32, %c0_i32_0 : i32, i32
  }
  func.func @transform_4(%arg0: i32) -> (i32, i32) {
    %c0_i32 = arith.constant 0 : i32
    %c0_i32_0 = arith.constant 0 : i32
    %c0_i32_1 = arith.constant 0 : i32
    return %c0_i32, %c0_i32_0 : i32, i32
  }
  func.func @transform_5(%arg0: i32) -> (i32, i32) {
    %c0_i32 = arith.constant 0 : i32
    %c0_i32_0 = arith.constant 0 : i32
    %c0_i32_1 = arith.constant 0 : i32
    return %c0_i32, %c0_i32_0 : i32, i32
  }
  func.func @transform_6(%arg0: i32) -> (i32, i32) {
    %c0_i32 = arith.constant 0 : i32
    %c0_i32_0 = arith.constant 0 : i32
    %c0_i32_1 = arith.constant 0 : i32
    return %c0_i32, %c0_i32_0 : i32, i32
  }
  func.func @transform_7(%arg0: i32) -> (i32, i32) {
    %c0_i32 = arith.constant 0 : i32
    %c0_i32_0 = arith.constant 0 : i32
    %c0_i32_1 = arith.constant 0 : i32
    return %c0_i32, %c0_i32_0 : i32, i32
  }
  func.func @transform_8(%arg0: i32) -> (i32, i32) {
    %c0_i32 = arith.constant 0 : i32
    %c0_i32_0 = arith.constant 0 : i32
    %c0_i32_1 = arith.constant 0 : i32
    return %c0_i32, %c0_i32_0 : i32, i32
  }
  func.func @transform_9(%arg0: i32) -> (i32, i32) {
    %c0_i32 = arith.constant 0 : i32
    %c0_i32_0 = arith.constant 0 : i32
    %c0_i32_1 = arith.constant 0 : i32
    return %c0_i32, %c0_i32_0 : i32, i32
  }
  func.func @transform_10(%arg0: i32) -> (i32, i32) {
    %c0_i32 = arith.constant 0 : i32
    %c0_i32_0 = arith.constant 0 : i32
    %c0_i32_1 = arith.constant 0 : i32
    return %c0_i32, %c0_i32_0 : i32, i32
  }
  func.func @transform_11(%arg0: i32) -> (i32, i32) {
    %c0_i32 = arith.constant 0 : i32
    %c0_i32_0 = arith.constant 0 : i32
    return %arg0, %c0_i32 : i32, i32
  }
}

</mosaic_0001>

<bundles_post_ra>
// kernel: feedforward_forward.1
= control target key start
LH: loop header
LB: loop body
LE: loop exit
PB: predicated region body
PF: predicated region fallthrough
CT: control target
= control target key end

     0   :  { %s2742_s0 = inlined_call_operand.vmem [shape: f32[8,500], index: 0, kind: input, shape index: {}]   ;;  %s2743_s1 = inlined_call_operand.hbm [shape: bf16[500,512], index: 1, kind: input, shape index: {}]   ;;  %s2744_s2 = inlined_call_operand.vmem [shape: f32[1,512], index: 2, kind: input, shape index: {}]   ;;  %s2745_s3 = inlined_call_operand.hbm [shape: bf16[512,256], index: 3, kind: input, shape index: {}]   ;;  %s2746_s4 = inlined_call_operand.vmem [shape: f32[1,256], index: 4, kind: input, shape index: {}]   ;;  %s2747_s5 = inlined_call_operand.hbm [shape: bf16[256,128], index: 5, kind: input, shape index: {}]   ;;  %s2748_s6 = inlined_call_operand.vmem [shape: f32[1,128], index: 6, kind: input, shape index: {}]   ;;  %s2749_s7 = inlined_call_operand.vmem [shape: bf16[128,64], index: 7, kind: input, shape index: {}]   ;;  %s2750_s8 = inlined_call_operand.vmem [shape: f32[1,64], index: 8, kind: input, shape index: {}]   ;;  %s2751_s9 = inlined_call_operand.vmem [shape: f32[1,64], index: 9, kind: input, shape index: {}]   ;;  %s2752_s10 = inlined_call_operand.<no memory space> [shape: f32[1,1], index: 10, kind: input, shape index: {}]   ;;  %s2753_s11 = inlined_call_operand.vmem [shape: f32[8,1], index: 11, kind: output, shape index: {}]  }
   0x1   :  { %v16_v0 = vstv %s2752_s10 }
   0x2   :  { %17 = vst [vmem:[#allocation2] sm:$0x1] %v16_v0 }
   0x3   :  { %18 = vsyncpa [#allocation4], 0 }
   0x4   :  { %19 = vsyncpa [#allocation6], 0  ;;  %s2551_s19 = smov [#allocation5]   ;;  %s2481_s23 = scalar_lea.hbm %s2745_s3, 8192 }
   0x5   :  { %s41_s20 = sshll.u32 %s2551_s19, 4  ;;  %p2482_p0 = scmp.ne.s32.totalorder %s2745_s3, %s2481_s23  ;;  %s42_s20 = int_to_ptr.vmem [resolvable:$true] %s41_s20 }
   0x6   :  { %p2485_p1 = scmp.lt.u32.totalorder %s2481_s23, %s2745_s3 }
   0x8   :  { %p2487_p2 = pnand %p2485_p1, %p2482_p0 }
   0xa   :  { %2490 = shalt.err (!%p2487_p2)
}
   0xb   :  { %s2491_s10 = scalar_lea.vmem %s42_s20, 8192  ;;  %p2496_p4 = scmp.lt.s32.totalorder %s42_s20, %s42_s20 }
   0xc   :  { %p2492_p3 = scmp.ne.s32.totalorder %s42_s20, %s2491_s10  ;;  %p2497_p5 = scmp.lt.s32.totalorder %s2491_s10, %s2491_s10 }
   0xe   :  { %p2498_p6 = por %p2497_p5, %p2496_p4 }
  0x10   :  { %p2499_p7 = pnand %p2498_p6, %p2492_p3 }
  0x12   :  { %2502 = shalt.err (!%p2499_p7)
}
  0x13   :  { %s2552_s28 = smov 128   ;;  %s2553_s29 = smov 8  }
  0x14   :  { %47 = dma.hbm_to_vmem [thread:$0]  %s2745_s3, 8192, %s42_s20, [#allocation6], %s2552_s28, %s2552_s28, %s2553_s29  }
  0x15   :  { %s2554_s13 = smov [#allocation3]   ;;  %s2503_s17 = scalar_lea.hbm %s2743_s1, 16128 }
  0x16   :  { %s27_s14 = sshll.u32 %s2554_s13, 4  ;;  %p2504_p8 = scmp.ne.s32.totalorder %s2743_s1, %s2503_s17  ;;  %s28_s14 = int_to_ptr.vmem [resolvable:$true] %s27_s14 }
  0x17   :  { %p2507_p9 = scmp.lt.u32.totalorder %s2503_s17, %s2743_s1 }
  0x19   :  { %p2509_p10 = pnand %p2507_p9, %p2504_p8 }
  0x1b   :  { %2512 = shalt.err (!%p2509_p10)
}
  0x1c   :  { %s2513_s23 = scalar_lea.vmem %s28_s14, 16128  ;;  %p2518_p12 = scmp.lt.s32.totalorder %s28_s14, %s28_s14 }
  0x1d   :  { %p2514_p11 = scmp.ne.s32.totalorder %s28_s14, %s2513_s23  ;;  %p2519_p13 = scmp.lt.s32.totalorder %s2513_s23, %s2513_s23 }
  0x1f   :  { %p2520_p0 = por %p2519_p13, %p2518_p12 }
  0x21   :  { %p2521_p1 = pnand %p2520_p0, %p2514_p11 }
  0x23   :  { %2524 = shalt.err (!%p2521_p1)
}
  0x24   :  { %s2555_s3 = smov 256   ;;  %s2556_s20 = smov 16  }
  0x25   :  { %33 = dma.hbm_to_vmem [thread:$0]  %s2743_s1, 16128, %s28_s14, [#allocation4], %s2555_s3, %s2555_s3, %s2556_s20  }
  0x26   :  { %s2557_s26 = smov [#allocation7]   ;;  %s2525_s29 = scalar_lea.hbm %s2747_s5, 2048 }
  0x27   :  { %s55_s27 = sshll.u32 %s2557_s26, 4  ;;  %p2526_p2 = scmp.ne.s32.totalorder %s2747_s5, %s2525_s29  ;;  %s56_s27 = int_to_ptr.vmem [resolvable:$true] %s55_s27 }
  0x28   :  { %p2529_p3 = scmp.lt.u32.totalorder %s2525_s29, %s2747_s5 }
  0x2a   :  { %p2531_p4 = pnand %p2529_p3, %p2526_p2 }
  0x2c   :  { %2534 = shalt.err (!%p2531_p4)
}
  0x2d   :  { %s2535_s16 = scalar_lea.vmem %s56_s27, 2048  ;;  %p2540_p6 = scmp.lt.s32.totalorder %s56_s27, %s56_s27 }
  0x2e   :  { %p2536_p5 = scmp.ne.s32.totalorder %s56_s27, %s2535_s16  ;;  %p2541_p7 = scmp.lt.s32.totalorder %s2535_s16, %s2535_s16 }
  0x30   :  { %p2542_p8 = por %p2541_p7, %p2540_p6 }
  0x32   :  { %p2543_p9 = pnand %p2542_p8, %p2536_p5 }
  0x34   :  { %2546 = shalt.err (!%p2543_p9)
}
  0x35   :  { %s2558_s1 = smov 64   ;;  %s2559_s14 = smov 4  }
  0x36   :  { %61 = dma.hbm_to_vmem [thread:$0]  %s2747_s5, 2048, %s56_s27, [#allocation6], %s2558_s1, %s2558_s1, %s2559_s14  }
  0x37   :  { %2547 = dma.done.wait [#allocation4], 16128  }
  0x38   :  { %2548 = vsyncadd [#allocation4], 4294951168 }
  0x39   :  { %2549 = dma.done.wait [#allocation6], 10240  }
  0x3a   :  { %2550 = vsyncadd [#allocation6], 4294957056  ;;  %v2167_v1 = vld [vmem:[#allocation3 + $0x4] ss:$16 sps:$4 sm:$0xff]   ;;  %v2169_v2 = vld [vmem:[#allocation3 + $0xc] ss:$16 sps:$4 sm:$0xff]  }
  0x3b   :  { %885 = vmatprep.subr.bf16.mxu0 %v2167_v1  ;;  %v2171_v3 = vld [vmem:[#allocation3] ss:$16 sps:$4 sm:$0xff]   ;;  %v2172_v4 = vld [vmem:[#allocation3 + $0x8] ss:$16 sps:$4 sm:$0xff]   ;;  %967 = vmatprep.subr.bf16.mxu1 %v2169_v2  ;;  %v2173_v5 = vld [vmem:[#allocation3 + $0x24] ss:$16 sps:$4 sm:$0xff]  }
  0x3c   :  { %886 = vmatpush1.bf16.msra.mxu0 %v2171_v3  ;;  %968 = vmatpush1.bf16.msra.mxu1 %v2172_v4  ;;  %v2175_v6 = vld [vmem:[#allocation3 + $0x2c] ss:$16 sps:$4 sm:$0xff]   ;;  %v2177_v7 = vld [vmem:[#allocation3 + $0x20] ss:$16 sps:$4 sm:$0xff]   ;;  %v2178_v8 = vld [vmem:[#allocation3 + $0x28] ss:$16 sps:$4 sm:$0xff]  }
  0x3d   :  { %887 = vmatprep.subr.bf16.mxu0 %v2173_v5  ;;  %969 = vmatprep.subr.bf16.mxu1 %v2175_v6  ;;  %v2179_v9 = vld [vmem:[#allocation3 + $0x44] ss:$16 sps:$4 sm:$0xff]   ;;  %v2181_v10 = vld [vmem:[#allocation3 + $0x4c] ss:$16 sps:$4 sm:$0xff]   ;;  %v2183_v11 = vld [vmem:[#allocation3 + $0x40] ss:$16 sps:$4 sm:$0xff]  }
  0x3e   :  { %v2184_v12 = vld [vmem:[#allocation3 + $0x48] ss:$16 sps:$4 sm:$0xff]   ;;  %v2185_v13 = vld [vmem:[#allocation3 + $0x64] ss:$16 sps:$4 sm:$0xff]   ;;  %v2187_v14 = vld [vmem:[#allocation3 + $0x6c] ss:$16 sps:$4 sm:$0xff]  }
  0x3f   :  { %v2189_v15 = vld [vmem:[#allocation3 + $0x60] ss:$16 sps:$4 sm:$0xff]   ;;  %v2190_v16 = vld [vmem:[#allocation3 + $0x68] ss:$16 sps:$4 sm:$0xff]   ;;  %v2191_v17 = vld [vmem:[#allocation3 + $0x84] ss:$16 sps:$4 sm:$0xff]  }
  0x40   :  { %888 = vmatpush1.bf16.msra.mxu0 %v2177_v7  ;;  %970 = vmatpush1.bf16.msra.mxu1 %v2178_v8  ;;  %v2193_v18 = vld [vmem:[#allocation3 + $0x8c] ss:$16 sps:$4 sm:$0xff]   ;;  %v2195_v19 = vld [vmem:[#allocation3 + $0x80] ss:$16 sps:$4 sm:$0xff]   ;;  %v2196_v20 = vld [vmem:[#allocation3 + $0x88] ss:$16 sps:$4 sm:$0xff]  }
  0x41   :  { %889 = vmatprep.subr.bf16.mxu0 %v2179_v9  ;;  %971 = vmatprep.subr.bf16.mxu1 %v2181_v10  ;;  %v2197_v21 = vld [vmem:[#allocation3 + $0xa4] ss:$16 sps:$4 sm:$0xff]   ;;  %v2199_v22 = vld [vmem:[#allocation3 + $0xac] ss:$16 sps:$4 sm:$0xff]   ;;  %v2201_v23 = vld [vmem:[#allocation3 + $0xa0] ss:$16 sps:$4 sm:$0xff]  }
  0x42   :  { %v2202_v24 = vld [vmem:[#allocation3 + $0xa8] ss:$16 sps:$4 sm:$0xff]   ;;  %v2203_v25 = vld [vmem:[#allocation3 + $0xc4] ss:$16 sps:$4 sm:$0xff]   ;;  %v2205_v26 = vld [vmem:[#allocation3 + $0xcc] ss:$16 sps:$4 sm:$0xff]  }
  0x43   :  { %v2207_v27 = vld [vmem:[#allocation3 + $0xc0] ss:$16 sps:$4 sm:$0xff]   ;;  %v2208_v28 = vld [vmem:[#allocation3 + $0xc8] ss:$16 sps:$4 sm:$0xff]   ;;  %v2209_v29 = vld [vmem:[#allocation3 + $0xe4] ss:$16 sps:$4 sm:$0xff]  }
  0x44   :  { %890 = vmatpush1.bf16.msra.mxu0 %v2183_v11  ;;  %972 = vmatpush1.bf16.msra.mxu1 %v2184_v12  ;;  %v2211_v30 = vld [vmem:[#allocation3 + $0xec] ss:$16 sps:$4 sm:$0xff]   ;;  %v2213_v31 = vld [vmem:[#allocation3 + $0xe0] ss:$16 sps:$4 sm:$0xff]   ;;  %v2214_v32 = vld [vmem:[#allocation3 + $0xe8] ss:$16 sps:$4 sm:$0xff]  }
  0x45   :  { %891 = vmatprep.subr.bf16.mxu0 %v2185_v13  ;;  %973 = vmatprep.subr.bf16.mxu1 %v2187_v14  ;;  %v2215_v33 = vld [vmem:[#allocation3 + $0x104] ss:$16 sps:$4 sm:$0xff]   ;;  %v2217_v34 = vld [vmem:[#allocation3 + $0x10c] ss:$16 sps:$4 sm:$0xff]   ;;  %v2219_v35 = vld [vmem:[#allocation3 + $0x100] ss:$16 sps:$4 sm:$0xff]  }
  0x46   :  { %v2220_v36 = vld [vmem:[#allocation3 + $0x108] ss:$16 sps:$4 sm:$0xff]   ;;  %v2221_v37 = vld [vmem:[#allocation3 + $0x124] ss:$16 sps:$4 sm:$0xff]   ;;  %v2223_v38 = vld [vmem:[#allocation3 + $0x12c] ss:$16 sps:$4 sm:$0xff]  }
  0x47   :  { %v2225_v39 = vld [vmem:[#allocation3 + $0x120] ss:$16 sps:$4 sm:$0xff]   ;;  %v2226_v40 = vld [vmem:[#allocation3 + $0x128] ss:$16 sps:$4 sm:$0xff]   ;;  %v2227_v41 = vld [vmem:[#allocation3 + $0x144] ss:$16 sps:$4 sm:$0xff]  }
  0x48   :  { %892 = vmatpush1.bf16.msra.mxu0 %v2189_v15  ;;  %974 = vmatpush1.bf16.msra.mxu1 %v2190_v16  ;;  %v2229_v42 = vld [vmem:[#allocation3 + $0x14c] ss:$16 sps:$4 sm:$0xff]   ;;  %v2231_v43 = vld [vmem:[#allocation3 + $0x140] ss:$16 sps:$4 sm:$0xff]   ;;  %v2232_v44 = vld [vmem:[#allocation3 + $0x148] ss:$16 sps:$4 sm:$0xff]  }
  0x49   :  { %893 = vmatprep.subr.bf16.mxu0 %v2191_v17  ;;  %975 = vmatprep.subr.bf16.mxu1 %v2193_v18  ;;  %v2233_v45 = vld [vmem:[#allocation3 + $0x164] ss:$16 sps:$4 sm:$0xff]   ;;  %v2235_v46 = vld [vmem:[#allocation3 + $0x16c] ss:$16 sps:$4 sm:$0xff]   ;;  %v2237_v48 = vld [vmem:[#allocation3 + $0x160] ss:$16 sps:$4 sm:$0xff]  }
  0x4a   :  { %v83_v47 = vld [vmem:[%s2742_s0 + $0x8] sm:$0xff]  ;;  %v2243_v53 = vld [vmem:[#allocation3 + $0x180] ss:$16 sps:$4 sm:$0xff]   ;;  %vm868_vm0 = vcmask 949248   ;;  %vm872_vm1 = vcmask 1041408   ;;  %vm2561_vm2 = vmmov 0  }
  0x4b   :  { %v87_v49 = vpack.c.bf16 %v83_v47, %v83_v47  ;;  %v2238_v50 = vld [vmem:[#allocation3 + $0x168] ss:$16 sps:$4 sm:$0xff]   ;;  %v2239_v51 = vld [vmem:[#allocation3 + $0x184] ss:$16 sps:$4 sm:$0xff]   ;;  %v2241_v52 = vld [vmem:[#allocation3 + $0x18c] ss:$16 sps:$4 sm:$0xff]  }
  0x4c   :  { %894 = vmatpush1.bf16.msra.mxu0 %v2195_v19  ;;  %976 = vmatpush1.bf16.msra.mxu1 %v2196_v20  ;;  %v2244_v54 = vld [vmem:[#allocation3 + $0x188] ss:$16 sps:$4 sm:$0xff]   ;;  %v2245_v55 = vld [vmem:[#allocation3 + $0x1a4] ss:$16 sps:$4 sm:$0xff]   ;;  %v2247_v56 = vld [vmem:[#allocation3 + $0x1ac] ss:$16 sps:$4 sm:$0xff]  }
  0x4d   :  { %895 = vmatprep.subr.bf16.mxu0 %v2197_v21  ;;  %977 = vmatprep.subr.bf16.mxu1 %v2199_v22  ;;  %v2249_v57 = vld [vmem:[#allocation3 + $0x1a0] ss:$16 sps:$4 sm:$0xff]   ;;  %v2250_v58 = vld [vmem:[#allocation3 + $0x1a8] ss:$16 sps:$4 sm:$0xff]   ;;  %v2251_v59 = vld [vmem:[#allocation3 + $0x1c4] ss:$16 sps:$4 sm:$0xff]  }
  0x4e   :  { %917 = vmatprep.mubr.bf16.mxu0 %v87_v49  ;;  %999 = vmatprep.mubr.bf16.mxu1 %v87_v49  ;;  %v2253_v60 = vld [vmem:[#allocation3 + $0x1cc] ss:$16 sps:$4 sm:$0xff]   ;;  %v2255_v61 = vld [vmem:[#allocation3 + $0x1c0] ss:$16 sps:$4 sm:$0xff]   ;;  %v2256_v62 = vld [vmem:[#allocation3 + $0x1c8] ss:$16 sps:$4 sm:$0xff]  }
  0x4f   :  { %v2257_v63 = vld [vmem:[#allocation3 + $0x1e4] ss:$16 sps:$4 sm:$0xff]   ;;  %v2259_v0 = vld [vmem:[#allocation3 + $0x1ec] ss:$16 sps:$4 sm:$0xff]   ;;  %v2261_v1 = vld [vmem:[#allocation3 + $0x1e0] ss:$16 sps:$4 sm:$0xff]  }
  0x50   :  { %896 = vmatpush1.bf16.msra.mxu0 %v2201_v23  ;;  %978 = vmatpush1.bf16.msra.mxu1 %v2202_v24  ;;  %v2262_v2 = vld [vmem:[#allocation3 + $0x1e8] ss:$16 sps:$4 sm:$0xff]   ;;  %v82_v3 = vld [vmem:[%s2742_s0] sm:$0xff]  ;;  %vm1836_vm3 = vcmask 523264   ;;  %vm1854_vm4 = vcmask 7168  }
  0x51   :  { %897 = vmatprep.subr.bf16.mxu0 %v2203_v25  ;;  %979 = vmatprep.subr.bf16.mxu1 %v2205_v26  ;;  %v2265_v4 = vld [vmem:[#allocation3 + $0x204] ss:$16 sps:$4 sm:$0xff]   ;;  %v2268_v5 = vld [vmem:[#allocation3 + $0x20c] ss:$16 sps:$4 sm:$0xff]   ;;  %v86_v6 = vpack.c.bf16 %v82_v3, %v82_v3  ;;  %v2263_v7 = vld [vmem:[#allocation3 + $0x200] ss:$16 sps:$4 sm:$0xff]  }
  0x52   :  { %v2266_v8 = vld [vmem:[#allocation3 + $0x208] ss:$16 sps:$4 sm:$0xff]   ;;  %v2271_v9 = vld [vmem:[#allocation3 + $0x224] ss:$16 sps:$4 sm:$0xff]   ;;  %v2274_v10 = vld [vmem:[#allocation3 + $0x22c] ss:$16 sps:$4 sm:$0xff]  }
  0x53   :  { %v2269_v11 = vld [vmem:[#allocation3 + $0x220] ss:$16 sps:$4 sm:$0xff]   ;;  %v2272_v12 = vld [vmem:[#allocation3 + $0x228] ss:$16 sps:$4 sm:$0xff]   ;;  %v2277_v13 = vld [vmem:[#allocation3 + $0x244] ss:$16 sps:$4 sm:$0xff]  }
  0x54   :  { %898 = vmatpush1.bf16.msra.mxu0 %v2207_v27  ;;  %980 = vmatpush1.bf16.msra.mxu1 %v2208_v28  ;;  %v2280_v14 = vld [vmem:[#allocation3 + $0x24c] ss:$16 sps:$4 sm:$0xff]   ;;  %v2275_v15 = vld [vmem:[#allocation3 + $0x240] ss:$16 sps:$4 sm:$0xff]   ;;  %v2278_v16 = vld [vmem:[#allocation3 + $0x248] ss:$16 sps:$4 sm:$0xff]  }
  0x55   :  { %899 = vmatprep.subr.bf16.mxu0 %v2209_v29  ;;  %981 = vmatprep.subr.bf16.mxu1 %v2211_v30  ;;  %v2283_v17 = vld [vmem:[#allocation3 + $0x264] ss:$16 sps:$4 sm:$0xff]   ;;  %v2286_v18 = vld [vmem:[#allocation3 + $0x26c] ss:$16 sps:$4 sm:$0xff]   ;;  %v2281_v19 = vld [vmem:[#allocation3 + $0x260] ss:$16 sps:$4 sm:$0xff]  }
  0x56   :  { %v2284_v20 = vld [vmem:[#allocation3 + $0x268] ss:$16 sps:$4 sm:$0xff]   ;;  %v2289_v21 = vld [vmem:[#allocation3 + $0x284] ss:$16 sps:$4 sm:$0xff]   ;;  %v2292_v22 = vld [vmem:[#allocation3 + $0x28c] ss:$16 sps:$4 sm:$0xff]  }
  0x57   :  { %v2287_v23 = vld [vmem:[#allocation3 + $0x280] ss:$16 sps:$4 sm:$0xff]   ;;  %v2290_v24 = vld [vmem:[#allocation3 + $0x288] ss:$16 sps:$4 sm:$0xff]   ;;  %v2295_v25 = vld [vmem:[#allocation3 + $0x2a4] ss:$16 sps:$4 sm:$0xff]  }
  0x58   :  { %900 = vmatpush1.bf16.msra.mxu0 %v2213_v31  ;;  %982 = vmatpush1.bf16.msra.mxu1 %v2214_v32  ;;  %v2298_v26 = vld [vmem:[#allocation3 + $0x2ac] ss:$16 sps:$4 sm:$0xff]   ;;  %v2293_v27 = vld [vmem:[#allocation3 + $0x2a0] ss:$16 sps:$4 sm:$0xff]   ;;  %v2296_v28 = vld [vmem:[#allocation3 + $0x2a8] ss:$16 sps:$4 sm:$0xff]  }
  0x59   :  { %901 = vmatprep.subr.bf16.mxu0 %v2215_v33  ;;  %983 = vmatprep.subr.bf16.mxu1 %v2217_v34  ;;  %v85_v29 = vld [vmem:[%s2742_s0 + $0x18] sm:$0xff]  ;;  %v2299_v33 = vld [vmem:[#allocation3 + $0x2c0] ss:$16 sps:$4 sm:$0xff]  }
  0x5a   :  { %v2301_v30 = vld [vmem:[#allocation3 + $0x2c4] ss:$16 sps:$4 sm:$0xff]   ;;  %v2304_v31 = vld [vmem:[#allocation3 + $0x2cc] ss:$16 sps:$4 sm:$0xff]   ;;  %v89_v32 = vpack.c.bf16 %v85_v29, %v85_v29  ;;  %v2302_v34 = vld [vmem:[#allocation3 + $0x2c8] ss:$16 sps:$4 sm:$0xff]  }
  0x5b   :  { %v2325_v47 = vld [vmem:[#allocation3 + $0x344] ss:$16 sps:$4 sm:$0xff]   ;;  %v2323_v49 = vld [vmem:[#allocation3 + $0x340] ss:$16 sps:$4 sm:$0xff]  }
  0x5c   :  { %902 = vmatpush1.bf16.msra.mxu0 %v2219_v35  ;;  %984 = vmatpush1.bf16.msra.mxu1 %v2220_v36  ;;  %v2307_v35 = vld [vmem:[#allocation3 + $0x2e4] ss:$16 sps:$4 sm:$0xff]   ;;  %v2310_v36 = vld [vmem:[#allocation3 + $0x2ec] ss:$16 sps:$4 sm:$0xff]  }
  0x5d   :  { %903 = vmatprep.subr.bf16.mxu0 %v2221_v37  ;;  %985 = vmatprep.subr.bf16.mxu1 %v2223_v38  ;;  %v2305_v37 = vld [vmem:[#allocation3 + $0x2e0] ss:$16 sps:$4 sm:$0xff]   ;;  %v2308_v38 = vld [vmem:[#allocation3 + $0x2e8] ss:$16 sps:$4 sm:$0xff]   ;;  %v2349_v3 = vld [vmem:[#allocation3 + $0x3c4] ss:$16 sps:$4 sm:$0xff]  }
  0x5e   :  { %v2383_v29 = vld [vmem:[#allocation5 + $0x84] ss:$8 sps:$4 sm:$0xff]  }
  0x60   :  { %904 = vmatpush1.bf16.msra.mxu0 %v2225_v39  ;;  %986 = vmatpush1.bf16.msra.mxu1 %v2226_v40  ;;  %v2313_v39 = vld [vmem:[#allocation3 + $0x304] ss:$16 sps:$4 sm:$0xff]   ;;  %v2316_v40 = vld [vmem:[#allocation3 + $0x30c] ss:$16 sps:$4 sm:$0xff]  }
  0x61   :  { %905 = vmatprep.subr.bf16.mxu0 %v2227_v41  ;;  %987 = vmatprep.subr.bf16.mxu1 %v2229_v42  ;;  %v2311_v41 = vld [vmem:[#allocation3 + $0x300] ss:$16 sps:$4 sm:$0xff]   ;;  %v2314_v42 = vld [vmem:[#allocation3 + $0x308] ss:$16 sps:$4 sm:$0xff]  }
  0x64   :  { %906 = vmatpush1.bf16.msra.mxu0 %v2231_v43  ;;  %988 = vmatpush1.bf16.msra.mxu1 %v2232_v44  ;;  %v2319_v43 = vld [vmem:[#allocation3 + $0x324] ss:$16 sps:$4 sm:$0xff]   ;;  %v2322_v44 = vld [vmem:[#allocation3 + $0x32c] ss:$16 sps:$4 sm:$0xff]  }
  0x65   :  { %907 = vmatprep.subr.bf16.mxu0 %v2233_v45  ;;  %989 = vmatprep.subr.bf16.mxu1 %v2235_v46  ;;  %v2317_v45 = vld [vmem:[#allocation3 + $0x320] ss:$16 sps:$4 sm:$0xff]   ;;  %v2320_v46 = vld [vmem:[#allocation3 + $0x328] ss:$16 sps:$4 sm:$0xff]  }
  0x68   :  { %908 = vmatpush1.bf16.msra.mxu0 %v2237_v48  ;;  %990 = vmatpush1.bf16.msra.mxu1 %v2238_v50  ;;  %v2328_v48 = vld [vmem:[#allocation3 + $0x34c] ss:$16 sps:$4 sm:$0xff]   ;;  %v2326_v50 = vld [vmem:[#allocation3 + $0x348] ss:$16 sps:$4 sm:$0xff]  }
  0x69   :  { %909 = vmatprep.subr.bf16.mxu0 %v2239_v51  ;;  %991 = vmatprep.subr.bf16.mxu1 %v2241_v52  ;;  %v2331_v51 = vld [vmem:[#allocation3 + $0x364] ss:$16 sps:$4 sm:$0xff]   ;;  %v2334_v52 = vld [vmem:[#allocation3 + $0x36c] ss:$16 sps:$4 sm:$0xff]  }
  0x6c   :  { %910 = vmatpush1.bf16.msra.mxu0 %v2243_v53  ;;  %992 = vmatpush1.bf16.msra.mxu1 %v2244_v54  ;;  %v2329_v53 = vld [vmem:[#allocation3 + $0x360] ss:$16 sps:$4 sm:$0xff]   ;;  %v2332_v54 = vld [vmem:[#allocation3 + $0x368] ss:$16 sps:$4 sm:$0xff]  }
  0x6d   :  { %911 = vmatprep.subr.bf16.mxu0 %v2245_v55  ;;  %993 = vmatprep.subr.bf16.mxu1 %v2247_v56  ;;  %v214_v55 = vld [vmem:[#allocation3 + $0x3e0] sm:$0x33]  ;;  %v215_v56 = vld [vmem:[#allocation3 + $0x3e8] sm:$0x33] }
  0x70   :  { %912 = vmatpush1.bf16.msra.mxu0 %v2249_v57  ;;  %994 = vmatpush1.bf16.msra.mxu1 %v2250_v58  ;;  %v2337_v57 = vld [vmem:[#allocation3 + $0x384] ss:$16 sps:$4 sm:$0xff]   ;;  %v2340_v58 = vld [vmem:[#allocation3 + $0x38c] ss:$16 sps:$4 sm:$0xff]  }
  0x71   :  { %913 = vmatprep.subr.bf16.mxu0 %v2251_v59  ;;  %995 = vmatprep.subr.bf16.mxu1 %v2253_v60  ;;  %v2335_v59 = vld [vmem:[#allocation3 + $0x380] ss:$16 sps:$4 sm:$0xff]   ;;  %v2338_v60 = vld [vmem:[#allocation3 + $0x388] ss:$16 sps:$4 sm:$0xff]  }
  0x74   :  { %914 = vmatpush1.bf16.msra.mxu0 %v2255_v61  ;;  %996 = vmatpush1.bf16.msra.mxu1 %v2256_v62  ;;  %v2343_v61 = vld [vmem:[#allocation3 + $0x3a4] ss:$16 sps:$4 sm:$0xff]   ;;  %v2346_v62 = vld [vmem:[#allocation3 + $0x3ac] ss:$16 sps:$4 sm:$0xff]  }
  0x75   :  { %915 = vmatprep.subr.bf16.mxu0 %v2257_v63  ;;  %997 = vmatprep.subr.bf16.mxu1 %v2259_v0  ;;  %v1986_v63 = vcombine.low %v214_v55, %v214_v55  ;;  %v1988_v0 = vcombine.low %v215_v56, %v215_v56 }
  0x78   :  { %916 = vmatpush1.bf16.msra.mxu0 %v2261_v1  ;;  %998 = vmatpush1.bf16.msra.mxu1 %v2262_v2  ;;  %v2341_v1 = vld [vmem:[#allocation3 + $0x3a0] ss:$16 sps:$4 sm:$0xff]   ;;  %v2344_v2 = vld [vmem:[#allocation3 + $0x3a8] ss:$16 sps:$4 sm:$0xff]  }
  0x79   :  { %926 = vmatprep.subr.bf16.mxu0 %v2265_v4  ;;  %1008 = vmatprep.subr.bf16.mxu1 %v2268_v5  ;;  %v2352_v4 = vld [vmem:[#allocation3 + $0x3cc] ss:$16 sps:$4 sm:$0xff]   ;;  %v874_v5 = vsel %vm872_vm1, %v1986_v63, 0 }
  0x7b   :  { %918 = vmatmul.mubr.bf16.vlgmr.msra.gmra.mrb[0].mxu0 %v86_v6  ;;  %1000 = vmatmul.mubr.bf16.vlgmr.msra.gmra.mrb[0].mxu1 %v86_v6  ;;  %v880_v6 = vsel %vm872_vm1, %v1988_v0, 0 }
  0x7c   :  { %927 = vmatpush1.bf16.msra.mxu0 %v2263_v7  ;;  %1009 = vmatpush1.bf16.msra.mxu1 %v2266_v8  ;;  %v2347_v7 = vld [vmem:[#allocation3 + $0x3c0] ss:$16 sps:$4 sm:$0xff]   ;;  %v2350_v8 = vld [vmem:[#allocation3 + $0x3c8] ss:$16 sps:$4 sm:$0xff]  }
  0x7d   :  { %928 = vmatprep.subr.bf16.mxu0 %v2271_v9  ;;  %1010 = vmatprep.subr.bf16.mxu1 %v2274_v10  ;;  %v1987_v9 = vcombine.high %v214_v55, %v214_v55  ;;  %v1989_v10 = vcombine.high %v215_v56, %v215_v56  ;;  %v2462_v55 = vld [vmem:[#allocation7 + $0x20] sm:$0xff]   ;;  %v2463_v56 = vld [vmem:[#allocation7 + $0x68] sm:$0xff]  }
  0x7e   :  { %1991 = vmatprep.mubr.msk.bf16.mxu0 %vm868_vm0, %v89_v32  ;;  %1993 = vmatprep.mubr.msk.bf16.mxu1 %vm868_vm0, %v89_v32  ;;  %v2384_v32 = vld [vmem:[#allocation5 + $0x90] ss:$8 sps:$4 sm:$0xff]  }
  0x80   :  { %929 = vmatpush1.bf16.msra.mxu0 %v2269_v11  ;;  %1011 = vmatpush1.bf16.msra.mxu1 %v2272_v12  ;;  %v84_v11 = vld [vmem:[%s2742_s0 + $0x10] sm:$0xff] }
  0x81   :  { %930 = vmatprep.subr.bf16.mxu0 %v2277_v13  ;;  %1012 = vmatprep.subr.bf16.mxu1 %v2280_v14  ;;  %v2359_v12 = vld [vmem:[#allocation5 + $0x4] ss:$8 sps:$4 sm:$0xff]   ;;  %v2357_v13 = vld [vmem:[#allocation5] ss:$8 sps:$4 sm:$0xff]   ;;  %v88_v14 = vpack.c.bf16 %v84_v11, %v84_v11 }
  0x84   :  { %931 = vmatpush1.bf16.msra.mxu0 %v2275_v15  ;;  %1013 = vmatpush1.bf16.msra.mxu1 %v2278_v16  ;;  %v2362_v15 = vld [vmem:[#allocation5 + $0x14] ss:$8 sps:$4 sm:$0xff]   ;;  %v2360_v16 = vld [vmem:[#allocation5 + $0x10] ss:$8 sps:$4 sm:$0xff]  }
  0x85   :  { %932 = vmatprep.subr.bf16.mxu0 %v2283_v17  ;;  %1014 = vmatprep.subr.bf16.mxu1 %v2286_v18  ;;  %v2365_v17 = vld [vmem:[#allocation5 + $0x24] ss:$8 sps:$4 sm:$0xff]   ;;  %v2363_v18 = vld [vmem:[#allocation5 + $0x20] ss:$8 sps:$4 sm:$0xff]  }
  0x88   :  { %933 = vmatpush1.bf16.msra.mxu0 %v2281_v19  ;;  %1015 = vmatpush1.bf16.msra.mxu1 %v2284_v20  ;;  %v2368_v19 = vld [vmem:[#allocation5 + $0x34] ss:$8 sps:$4 sm:$0xff]   ;;  %v2366_v20 = vld [vmem:[#allocation5 + $0x30] ss:$8 sps:$4 sm:$0xff]  }
  0x89   :  { %934 = vmatprep.subr.bf16.mxu0 %v2289_v21  ;;  %1016 = vmatprep.subr.bf16.mxu1 %v2292_v22  ;;  %v2371_v21 = vld [vmem:[#allocation5 + $0x44] ss:$8 sps:$4 sm:$0xff]   ;;  %v2369_v22 = vld [vmem:[#allocation5 + $0x40] ss:$8 sps:$4 sm:$0xff]  }
  0x8c   :  { %935 = vmatpush1.bf16.msra.mxu0 %v2287_v23  ;;  %1017 = vmatpush1.bf16.msra.mxu1 %v2290_v24  ;;  %v2374_v23 = vld [vmem:[#allocation5 + $0x54] ss:$8 sps:$4 sm:$0xff]   ;;  %v2372_v24 = vld [vmem:[#allocation5 + $0x50] ss:$8 sps:$4 sm:$0xff]  }
  0x8d   :  { %936 = vmatprep.subr.bf16.mxu0 %v2295_v25  ;;  %1018 = vmatprep.subr.bf16.mxu1 %v2298_v26  ;;  %v2377_v25 = vld [vmem:[#allocation5 + $0x64] ss:$8 sps:$4 sm:$0xff]   ;;  %v2375_v26 = vld [vmem:[#allocation5 + $0x60] ss:$8 sps:$4 sm:$0xff]  }
  0x90   :  { %937 = vmatpush1.bf16.msra.mxu0 %v2293_v27  ;;  %1019 = vmatpush1.bf16.msra.mxu1 %v2296_v28  ;;  %v2380_v27 = vld [vmem:[#allocation5 + $0x74] ss:$8 sps:$4 sm:$0xff]   ;;  %v2378_v28 = vld [vmem:[#allocation5 + $0x70] ss:$8 sps:$4 sm:$0xff]  }
  0x91   :  { %938 = vmatprep.subr.bf16.mxu0 %v2301_v30  ;;  %1020 = vmatprep.subr.bf16.mxu1 %v2304_v31  ;;  %v2381_v30 = vld [vmem:[#allocation5 + $0x80] ss:$8 sps:$4 sm:$0xff]   ;;  %v2386_v31 = vld [vmem:[#allocation5 + $0x94] ss:$8 sps:$4 sm:$0xff]  }
  0x94   :  { %939 = vmatpush1.bf16.msra.mxu0 %v2299_v33  ;;  %1021 = vmatpush1.bf16.msra.mxu1 %v2302_v34  ;;  %v2389_v33 = vld [vmem:[#allocation5 + $0xa4] ss:$8 sps:$4 sm:$0xff]   ;;  %v2387_v34 = vld [vmem:[#allocation5 + $0xa0] ss:$8 sps:$4 sm:$0xff]  }
  0x95   :  { %940 = vmatprep.subr.bf16.mxu0 %v2307_v35  ;;  %1022 = vmatprep.subr.bf16.mxu1 %v2310_v36  ;;  %v2392_v35 = vld [vmem:[#allocation5 + $0xb4] ss:$8 sps:$4 sm:$0xff]   ;;  %v2390_v36 = vld [vmem:[#allocation5 + $0xb0] ss:$8 sps:$4 sm:$0xff]  }
  0x98   :  { %941 = vmatpush1.bf16.msra.mxu0 %v2305_v37  ;;  %1023 = vmatpush1.bf16.msra.mxu1 %v2308_v38  ;;  %v2395_v37 = vld [vmem:[#allocation5 + $0xc4] ss:$8 sps:$4 sm:$0xff]   ;;  %v2393_v38 = vld [vmem:[#allocation5 + $0xc0] ss:$8 sps:$4 sm:$0xff]  }
  0x99   :  { %942 = vmatprep.subr.bf16.mxu0 %v2313_v39  ;;  %1024 = vmatprep.subr.bf16.mxu1 %v2316_v40  ;;  %v2398_v39 = vld [vmem:[#allocation5 + $0xd4] ss:$8 sps:$4 sm:$0xff]   ;;  %v2396_v40 = vld [vmem:[#allocation5 + $0xd0] ss:$8 sps:$4 sm:$0xff]  }
  0x9c   :  { %943 = vmatpush1.bf16.msra.mxu0 %v2311_v41  ;;  %1025 = vmatpush1.bf16.msra.mxu1 %v2314_v42  ;;  %v2401_v41 = vld [vmem:[#allocation5 + $0xe4] ss:$8 sps:$4 sm:$0xff]   ;;  %v2399_v42 = vld [vmem:[#allocation5 + $0xe0] ss:$8 sps:$4 sm:$0xff]  }
  0x9d   :  { %944 = vmatprep.subr.bf16.mxu0 %v2319_v43  ;;  %1026 = vmatprep.subr.bf16.mxu1 %v2322_v44  ;;  %v2404_v43 = vld [vmem:[#allocation5 + $0xf4] ss:$8 sps:$4 sm:$0xff]   ;;  %v2402_v44 = vld [vmem:[#allocation5 + $0xf0] ss:$8 sps:$4 sm:$0xff]  }
  0xa0   :  { %945 = vmatpush1.bf16.msra.mxu0 %v2317_v45  ;;  %1027 = vmatpush1.bf16.msra.mxu1 %v2320_v46  ;;  %v2407_v45 = vld [vmem:[#allocation5 + $0x104] ss:$8 sps:$4 sm:$0xff]  }
  0xa1   :  { %946 = vmatprep.subr.bf16.mxu0 %v2325_v47  ;;  %1028 = vmatprep.subr.bf16.mxu1 %v2328_v48  ;;  %v2453_v46 = vld [vmem:[#allocation7 + $0x40] sm:$0xff]   ;;  %v2455_v48 = vld [vmem:[#allocation7 + $0x48] sm:$0xff]  }
  0xa2   :  { %v2454_v47 = vld [vmem:[#allocation7] sm:$0xff]  }
  0xa4   :  { %947 = vmatpush1.bf16.msra.mxu0 %v2323_v49  ;;  %1029 = vmatpush1.bf16.msra.mxu1 %v2326_v50  ;;  %v2456_v49 = vld [vmem:[#allocation7 + $0x8] sm:$0xff]   ;;  %v2457_v50 = vld [vmem:[#allocation7 + $0x50] sm:$0xff]  }
  0xa5   :  { %948 = vmatprep.subr.bf16.mxu0 %v2331_v51  ;;  %1030 = vmatprep.subr.bf16.mxu1 %v2334_v52  ;;  %v2458_v51 = vld [vmem:[#allocation7 + $0x10] sm:$0xff]   ;;  %v2459_v52 = vld [vmem:[#allocation7 + $0x58] sm:$0xff]  }
  0xa8   :  { %949 = vmatpush1.bf16.msra.mxu0 %v2329_v53  ;;  %1031 = vmatpush1.bf16.msra.mxu1 %v2332_v54  ;;  %v2460_v53 = vld [vmem:[#allocation7 + $0x18] sm:$0xff]   ;;  %v2461_v54 = vld [vmem:[#allocation7 + $0x60] sm:$0xff]  }
  0xa9   :  { %950 = vmatprep.subr.bf16.mxu0 %v2337_v57  ;;  %1032 = vmatprep.subr.bf16.mxu1 %v2340_v58  ;;  %v2464_v57 = vld [vmem:[#allocation7 + $0x28] sm:$0xff]   ;;  %v218_v58 = vlaneseq }
  0xac   :  { %951 = vmatpush1.bf16.msra.mxu0 %v2335_v59  ;;  %1033 = vmatpush1.bf16.msra.mxu1 %v2338_v60  ;;  %v2677_v59 = vshrl.u32 %v218_v58, 7  ;;  %v2467_v58 = vld [vmem:[#allocation7 + $0x78] sm:$0xff]  }
  0xad   :  { %952 = vmatprep.subr.bf16.mxu0 %v2343_v61  ;;  %1034 = vmatprep.subr.bf16.mxu1 %v2346_v62  ;;  %v2683_v61 = vld [vmem:[%s2744_s2] sm:$0xf] }
  0xae   :  { %v220_v60 = vsub.s32 0, %v2677_v59  ;;  %v224_v62 = vsub.s32 1, %v2677_v59  ;;  %v232_v63 = vsub.s32 3, %v2677_v59 }
  0xb0   :  { %953 = vmatpush1.bf16.msra.mxu0 %v2341_v1  ;;  %1035 = vmatpush1.bf16.msra.mxu1 %v2344_v2  ;;  %v221_v0 = vrot.slane %v2683_v61, %v220_v60  ;;  %v225_v1 = vrot.slane %v2683_v61, %v224_v62  ;;  %v233_v2 = vrot.slane %v2683_v61, %v232_v63  ;;  %v2560_v63 = vmov 0.0  }
  0xb1   :  { %954 = vmatprep.subr.bf16.mxu0 %v2349_v3  ;;  %1036 = vmatprep.subr.bf16.mxu1 %v2352_v4 }
  0xb4   :  { %955 = vmatpush1.bf16.msra.mxu0 %v2347_v7  ;;  %1037 = vmatpush1.bf16.msra.mxu1 %v2350_v8 }
  0xb5   :  { %1990 = vmatprep.subr.msk.bf16.mxu0 %vm872_vm1, %v1987_v9  ;;  %1992 = vmatprep.subr.msk.bf16.mxu1 %vm872_vm1, %v1989_v10 }
  0xb8   :  { %957 = vmatpush1.bf16.msra.mxu0 %v874_v5  ;;  %1039 = vmatpush1.bf16.msra.mxu1 %v880_v6 }
  0xb9   :  { %1453 = vmatprep.subr.bf16.mxu0 %v2359_v12  ;;  %2087 = vmatprep.subr.bf16.mxu1 %v2453_v46  ;;  %v2446_v46 = vld [vmem:[#allocation5 + $0x1d4] ss:$8 sps:$4 sm:$0xff]  }
  0xbb   :  { %959 = vmatmul.mubr.bf16.vlgmr.msra.gmra.mrb[0].mxu0 %v88_v14  ;;  %1041 = vmatmul.mubr.bf16.vlgmr.msra.gmra.mrb[0].mxu1 %v88_v14 }
  0xbc   :  { %1454 = vmatpush1.bf16.msra.mxu0 %v2357_v13  ;;  %2088 = vmatpush3.bf16.msra.mxu1 %v2454_v47  ;;  %v2444_v47 = vld [vmem:[#allocation5 + $0x1d0] ss:$8 sps:$4 sm:$0xff]  }
  0xbd   :  { %1455 = vmatprep.subr.bf16.mxu0 %v2362_v15  ;;  %2089 = vmatprep.subr.bf16.mxu1 %v2455_v48 }
  0xc0   :  { %1456 = vmatpush1.bf16.msra.mxu0 %v2360_v16  ;;  %2090 = vmatpush3.bf16.msra.mxu1 %v2456_v49  ;;  %v2449_v49 = vld [vmem:[#allocation5 + $0x1e4] ss:$8 sps:$4 sm:$0xff]  }
  0xc1   :  { %1457 = vmatprep.subr.bf16.mxu0 %v2365_v17  ;;  %2091 = vmatprep.subr.bf16.mxu1 %v2457_v50  ;;  %v2447_v50 = vld [vmem:[#allocation5 + $0x1e0] ss:$8 sps:$4 sm:$0xff]  }
  0xc4   :  { %1458 = vmatpush1.bf16.msra.mxu0 %v2363_v18  ;;  %2092 = vmatpush3.bf16.msra.mxu1 %v2458_v51  ;;  %v2405_v18 = vld [vmem:[#allocation5 + $0x100] ss:$8 sps:$4 sm:$0xff]  }
  0xc5   :  { %1459 = vmatprep.subr.bf16.mxu0 %v2368_v19  ;;  %2093 = vmatprep.subr.bf16.mxu1 %v2459_v52  ;;  %v2452_v52 = vld [vmem:[#allocation5 + $0x1f4] ss:$8 sps:$4 sm:$0xff]  }
  0xc8   :  { %1460 = vmatpush1.bf16.msra.mxu0 %v2366_v20  ;;  %2094 = vmatpush3.bf16.msra.mxu1 %v2460_v53  ;;  %v2410_v20 = vld [vmem:[#allocation5 + $0x114] ss:$8 sps:$4 sm:$0xff]   ;;  %v2450_v53 = vld [vmem:[#allocation5 + $0x1f0] ss:$8 sps:$4 sm:$0xff]  }
  0xc9   :  { %1461 = vmatprep.subr.bf16.mxu0 %v2371_v21  ;;  %2095 = vmatprep.subr.bf16.mxu1 %v2461_v54 }
  0xcc   :  { %1462 = vmatpush1.bf16.msra.mxu0 %v2369_v22  ;;  %2096 = vmatpush3.bf16.msra.mxu1 %v2462_v55  ;;  %v2408_v22 = vld [vmem:[#allocation5 + $0x110] ss:$8 sps:$4 sm:$0xff]  }
  0xcd   :  { %1463 = vmatprep.subr.bf16.mxu0 %v2374_v23  ;;  %2097 = vmatprep.subr.bf16.mxu1 %v2463_v56  ;;  %v2413_v23 = vld [vmem:[#allocation5 + $0x124] ss:$8 sps:$4 sm:$0xff]   ;;  %v2465_v56 = vld [vmem:[#allocation7 + $0x70] sm:$0xff]  }
  0xd0   :  { %1464 = vmatpush1.bf16.msra.mxu0 %v2372_v24  ;;  %2098 = vmatpush3.bf16.msra.mxu1 %v2464_v57  ;;  %v2411_v24 = vld [vmem:[#allocation5 + $0x120] ss:$8 sps:$4 sm:$0xff]   ;;  %v2466_v57 = vld [vmem:[#allocation7 + $0x30] sm:$0xff]  }
  0xd1   :  { %1465 = vmatprep.subr.bf16.mxu0 %v2377_v25  ;;  %v2416_v25 = vld [vmem:[#allocation5 + $0x134] ss:$8 sps:$4 sm:$0xff]   ;;  %2099 = vmatprep.subr.bf16.mxu1 %v2465_v56 }
  0xd4   :  { %1466 = vmatpush1.bf16.msra.mxu0 %v2375_v26  ;;  %v2414_v26 = vld [vmem:[#allocation5 + $0x130] ss:$8 sps:$4 sm:$0xff]   ;;  %2100 = vmatpush3.bf16.msra.mxu1 %v2466_v57 }
  0xd5   :  { %1467 = vmatprep.subr.bf16.mxu0 %v2380_v27  ;;  %v2419_v27 = vld [vmem:[#allocation5 + $0x144] ss:$8 sps:$4 sm:$0xff]   ;;  %2101 = vmatprep.subr.bf16.mxu1 %v2467_v58 }
  0xd8   :  { %1468 = vmatpush1.bf16.msra.mxu0 %v2378_v28  ;;  %v2417_v28 = vld [vmem:[#allocation5 + $0x140] ss:$8 sps:$4 sm:$0xff]  }
  0xd9   :  { %1469 = vmatprep.subr.bf16.mxu0 %v2383_v29  ;;  %v2422_v29 = vld [vmem:[#allocation5 + $0x154] ss:$8 sps:$4 sm:$0xff]  }
  0xdc   :  { %1470 = vmatpush1.bf16.msra.mxu0 %v2381_v30  ;;  %v2420_v30 = vld [vmem:[#allocation5 + $0x150] ss:$8 sps:$4 sm:$0xff]  }
  0xdd   :  { %1471 = vmatprep.subr.bf16.mxu0 %v2386_v31  ;;  %v2425_v31 = vld [vmem:[#allocation5 + $0x164] ss:$8 sps:$4 sm:$0xff]  }
  0xe0   :  { %1472 = vmatpush1.bf16.msra.mxu0 %v2384_v32  ;;  %v2423_v32 = vld [vmem:[#allocation5 + $0x160] ss:$8 sps:$4 sm:$0xff]  }
  0xe1   :  { %1473 = vmatprep.subr.bf16.mxu0 %v2389_v33  ;;  %v2428_v33 = vld [vmem:[#allocation5 + $0x174] ss:$8 sps:$4 sm:$0xff]  }
  0xe4   :  { %1474 = vmatpush1.bf16.msra.mxu0 %v2387_v34  ;;  %v2426_v34 = vld [vmem:[#allocation5 + $0x170] ss:$8 sps:$4 sm:$0xff]  }
  0xe5   :  { %1475 = vmatprep.subr.bf16.mxu0 %v2392_v35  ;;  %v2431_v35 = vld [vmem:[#allocation5 + $0x184] ss:$8 sps:$4 sm:$0xff]  }
  0xe8   :  { %1476 = vmatpush1.bf16.msra.mxu0 %v2390_v36  ;;  %v2429_v36 = vld [vmem:[#allocation5 + $0x180] ss:$8 sps:$4 sm:$0xff]  }
  0xe9   :  { %1477 = vmatprep.subr.bf16.mxu0 %v2395_v37  ;;  %v2434_v37 = vld [vmem:[#allocation5 + $0x194] ss:$8 sps:$4 sm:$0xff]  }
  0xec   :  { %1478 = vmatpush1.bf16.msra.mxu0 %v2393_v38  ;;  %v2432_v38 = vld [vmem:[#allocation5 + $0x190] ss:$8 sps:$4 sm:$0xff]  }
  0xed   :  { %1479 = vmatprep.subr.bf16.mxu0 %v2398_v39  ;;  %v2437_v39 = vld [vmem:[#allocation5 + $0x1a4] ss:$8 sps:$4 sm:$0xff]  }
  0xf0   :  { %1480 = vmatpush1.bf16.msra.mxu0 %v2396_v40  ;;  %v2435_v40 = vld [vmem:[#allocation5 + $0x1a0] ss:$8 sps:$4 sm:$0xff]  }
  0xf1   :  { %1481 = vmatprep.subr.bf16.mxu0 %v2401_v41  ;;  %v2440_v41 = vld [vmem:[#allocation5 + $0x1b4] ss:$8 sps:$4 sm:$0xff]  }
  0xf4   :  { %1482 = vmatpush1.bf16.msra.mxu0 %v2399_v42  ;;  %v2438_v42 = vld [vmem:[#allocation5 + $0x1b0] ss:$8 sps:$4 sm:$0xff]  }
  0xf5   :  { %1483 = vmatprep.subr.bf16.mxu0 %v2404_v43  ;;  %v2443_v43 = vld [vmem:[#allocation5 + $0x1c4] ss:$8 sps:$4 sm:$0xff]  }
  0xf8   :  { %1484 = vmatpush1.bf16.msra.mxu0 %v2402_v44  ;;  %v2441_v44 = vld [vmem:[#allocation5 + $0x1c0] ss:$8 sps:$4 sm:$0xff]  }
  0xf9   :  { %1494 = vmatprep.subr.bf16.mxu0 %v2407_v45  ;;  %v228_v45 = vsub.s32 2, %v2677_v59  ;;  %v2470_v59 = vld [vmem:[%s2749_s7 + $0x8] sm:$0xff]  }
  0xfb   :  { %v229_v48 = vrot.slane %v2683_v61, %v228_v45  ;;  %v2468_v61 = vld [vmem:[#allocation7 + $0x38] sm:$0xff]  }
  0xfc   :  { %2102 = vmatpush3.bf16.msra.mxu1 %v2468_v61 }
  0xfd   :  { %2118 = vmatprep.subr.bf16.mxu1 %v2560_v63 }
 0x18e   :  { %v960_v3 = vpop.f32.mrb[0].mxu0  ;;  %v2694_v4 = vpop.f32.mrb[0].mxu1 }
 0x18f   :  { %v2138_v5 = vadd.f32 %v960_v3, %v221_v0  ;;  %v962_v6 = vpop.f32.mrb[1].mxu0  ;;  %v1044_v7 = vpop.f32.mrb[1].mxu1  ;;  %v2140_v51 = vadd.f32 %v2694_v4, %v229_v48  ;;  %v1121_v0 = vld [vmem:[%s2746_s4] sm:$0x3] }
 0x190   :  { %v2139_v8 = vadd.f32 %v962_v6, %v225_v1  ;;  %v2141_v9 = vadd.f32 %v1044_v7, %v233_v2  ;;  %v964_v10 = vpop.f32.mrb[2].mxu0  ;;  %v1046_v11 = vpop.f32.mrb[2].mxu1  ;;  %v1126_v1 = vrot.slane %v1121_v0, %v220_v60  ;;  %v1130_v2 = vrot.slane %v1121_v0, %v224_v62  ;;  %v2471_v60 = vld [vmem:[%s2749_s7 + $0x10] sm:$0xff]   ;;  %v2472_v62 = vld [vmem:[%s2749_s7 + $0x18] sm:$0xff]  }
 0x191   :  { %v1049_v12 = vmax.f32 %v2138_v5, 0.0  ;;  %v965_v13 = vpop.f32.mrb[3].mxu0  ;;  %v1047_v14 = vpop.f32.mrb[3].mxu1  ;;  %v1051_v54 = vmax.f32 %v2140_v51, 0.0 }
 0x192   :  { %v1050_v15 = vmax.f32 %v2139_v8, 0.0  ;;  %v1052_v16 = vmax.f32 %v2141_v9, 0.0  ;;  %v2473_v14 = vld [vmem:[%s2749_s7 + $0x20] sm:$0xff]  }
 0x193   :  { %v1053_v19 = vpack.c.bf16 %v1049_v12, %v1049_v12  ;;  %v1055_v55 = vpack.c.bf16 %v1051_v54, %v1051_v54  ;;  %v2469_v12 = vld [vmem:[%s2749_s7] sm:$0xff]  }
 0x194   :  { %v1054_v17 = vpack.c.bf16 %v1050_v15, %v1050_v15  ;;  %v1056_v21 = vpack.c.bf16 %v1052_v16, %v1052_v16  ;;  %v2474_v15 = vld [vmem:[%s2749_s7 + $0x28] sm:$0xff]   ;;  %v2475_v16 = vld [vmem:[%s2749_s7 + $0x30] sm:$0xff]  }
 0x196   :  { %1485 = vmatprep.mubr.bf16.mxu0 %v1054_v17  ;;  %v2476_v17 = vld [vmem:[%s2749_s7 + $0x38] sm:$0xff]  }
 0x197   :  { %1486 = vmatmul.mubr.bf16.vlgmr.msra.gmra.mrb[4].mxu0 %v1053_v19  ;;  %v2058_v19 = vld [vmem:[%s2748_s6] ss:$0 sm:$0xff] }
 0x198   :  { %1495 = vmatpush1.bf16.msra.mxu0 %v2405_v18  ;;  %1526 = vmatprep.mubr.bf16.mxu0 %v1056_v21 }
 0x199   :  { %1496 = vmatprep.subr.bf16.mxu0 %v2410_v20 }
 0x19c   :  { %1497 = vmatpush1.bf16.msra.mxu0 %v2408_v22 }
 0x19d   :  { %1498 = vmatprep.subr.bf16.mxu0 %v2413_v23 }
 0x1a0   :  { %1499 = vmatpush1.bf16.msra.mxu0 %v2411_v24 }
 0x1a1   :  { %1500 = vmatprep.subr.bf16.mxu0 %v2416_v25 }
 0x1a4   :  { %1501 = vmatpush1.bf16.msra.mxu0 %v2414_v26 }
 0x1a5   :  { %1502 = vmatprep.subr.bf16.mxu0 %v2419_v27  ;;  %v2075_v27 = vld [vmem:[%s2750_s8] ss:$0 sm:$0xff] }
 0x1a8   :  { %1503 = vmatpush1.bf16.msra.mxu0 %v2417_v28 }
 0x1a9   :  { %1504 = vmatprep.subr.bf16.mxu0 %v2422_v29 }
 0x1ac   :  { %1505 = vmatpush1.bf16.msra.mxu0 %v2420_v30 }
 0x1ad   :  { %1506 = vmatprep.subr.bf16.mxu0 %v2425_v31 }
 0x1b0   :  { %1507 = vmatpush1.bf16.msra.mxu0 %v2423_v32  ;;  %v2084_v32 = vld [vmem:[%s2751_s9] ss:$0 sm:$0xff] }
 0x1b1   :  { %1508 = vmatprep.subr.bf16.mxu0 %v2428_v33 }
 0x1b4   :  { %1509 = vmatpush1.bf16.msra.mxu0 %v2426_v34 }
 0x1b5   :  { %1510 = vmatprep.subr.bf16.mxu0 %v2431_v35 }
 0x1b8   :  { %1511 = vmatpush1.bf16.msra.mxu0 %v2429_v36 }
 0x1b9   :  { %1512 = vmatprep.subr.bf16.mxu0 %v2434_v37  ;;  %v2085_v37 = vld [vmem:[#allocation2] ss:$0 sm:$0xff] }
 0x1bc   :  { %1513 = vmatpush1.bf16.msra.mxu0 %v2432_v38 }
 0x1bd   :  { %1514 = vmatprep.subr.bf16.mxu0 %v2437_v39 }
 0x1c0   :  { %1515 = vmatpush1.bf16.msra.mxu0 %v2435_v40 }
 0x1c1   :  { %1516 = vmatprep.subr.bf16.mxu0 %v2440_v41 }
 0x1c4   :  { %1517 = vmatpush1.bf16.msra.mxu0 %v2438_v42 }
 0x1c5   :  { %1518 = vmatprep.subr.bf16.mxu0 %v2443_v43 }
 0x1c8   :  { %1519 = vmatpush1.bf16.msra.mxu0 %v2441_v44 }
 0x1c9   :  { %1520 = vmatprep.subr.bf16.mxu0 %v2446_v46 }
 0x1cc   :  { %1521 = vmatpush1.bf16.msra.mxu0 %v2444_v47 }
 0x1cd   :  { %1522 = vmatprep.subr.bf16.mxu0 %v2449_v49 }
 0x1d0   :  { %1523 = vmatpush1.bf16.msra.mxu0 %v2447_v50 }
 0x1d1   :  { %1524 = vmatprep.subr.bf16.mxu0 %v2452_v52 }
 0x1d4   :  { %1525 = vmatpush1.bf16.msra.mxu0 %v2450_v53 }
 0x1d7   :  { %1527 = vmatmul.mubr.bf16.vlgmr.msra.gmra.mrb[4].mxu0 %v1055_v55 }
 0x2aa   :  { %v1528_v3 = vpop.f32.mrb[4].mxu0 }
 0x2ab   :  { %v2142_v4 = vadd.f32 %v1528_v3, %v1126_v1  ;;  %v1530_v5 = vpop.f32.mrb[5].mxu0 }
 0x2ac   :  { %v2143_v6 = vadd.f32 %v1530_v5, %v1130_v2  ;;  %v1532_v7 = vpop.f32.mrb[6].mxu0 }
 0x2ad   :  { %v1535_v8 = vmax.f32 %v2142_v4, 0.0  ;;  %v1533_v9 = vpop.f32.mrb[7].mxu0 }
 0x2ae   :  { %v1536_v10 = vmax.f32 %v2143_v6, 0.0 }
 0x2af   :  { %v1537_v13 = vpack.c.bf16 %v1535_v8, %v1535_v8 }
 0x2b0   :  { %v1538_v11 = vpack.c.bf16 %v1536_v10, %v1536_v10 }
 0x2b2   :  { %1706 = vmatprep.mubr.bf16.mxu1 %v1538_v11 }
 0x2b3   :  { %1707 = vmatmul.mubr.bf16.vlgmr.msra.gmra.mrb[4].mxu1 %v1537_v13 }
 0x2b4   :  { %2119 = vmatpush3.bf16.msra.mxu1 %v2469_v12  ;;  %2134 = vmatprep.mubr.msk.bf16.mxu1 %vm2561_vm2, %v2560_v63 }
 0x2b5   :  { %2120 = vmatprep.subr.bf16.mxu1 %v2560_v63 }
 0x2b8   :  { %2121 = vmatpush3.bf16.msra.mxu1 %v2470_v59 }
 0x2b9   :  { %2122 = vmatprep.subr.bf16.mxu1 %v2560_v63 }
 0x2bc   :  { %2123 = vmatpush3.bf16.msra.mxu1 %v2471_v60 }
 0x2bd   :  { %2124 = vmatprep.subr.bf16.mxu1 %v2560_v63 }
 0x2c0   :  { %2125 = vmatpush3.bf16.msra.mxu1 %v2472_v62 }
 0x2c1   :  { %2126 = vmatprep.subr.bf16.mxu1 %v2560_v63 }
 0x2c4   :  { %2127 = vmatpush3.bf16.msra.mxu1 %v2473_v14 }
 0x2c5   :  { %2128 = vmatprep.subr.bf16.mxu1 %v2560_v63 }
 0x2c8   :  { %2129 = vmatpush3.bf16.msra.mxu1 %v2474_v15 }
 0x2c9   :  { %2130 = vmatprep.subr.bf16.mxu1 %v2560_v63 }
 0x2cc   :  { %2131 = vmatpush3.bf16.msra.mxu1 %v2475_v16 }
 0x2cd   :  { %2132 = vmatprep.subr.bf16.mxu1 %v2560_v63 }
 0x2d0   :  { %2133 = vmatpush3.bf16.msra.mxu1 %v2476_v17 }
 0x386   :  { %v2103_v18 = vpop.f32.mrb[4].mxu1 }
 0x387   :  { %v2104_v20 = vpop.f32.mrb[5].mxu1 }
 0x388   :  { %v2105_v21 = vadd.f32 %v2104_v20, %v2103_v18  ;;  %v2106_v22 = vpop.f32.mrb[6].mxu1 }
 0x389   :  { %v2107_v23 = vpop.f32.mrb[7].mxu1 }
 0x38a   :  { %v1709_v24 = vadd.f32 %v2105_v21, %v2058_v19 }
 0x38c   :  { %v1714_v25 = vmax.f32 %v1709_v24, 0.0 }
 0x38e   :  { %v1715_v26 = vpack.c.bf16 %v1714_v25, %v1714_v25 }
 0x390   :  { %2135 = vmatmul.mubr.bf16.vlgmr.msra.gmra.mrb[8].mxu1 %v1715_v26 }
 0x463   :  { %v1821_v28 = vpop.f32.mrb[8].mxu1 }
 0x464   :  { %v1822_v29 = vadd.f32 %v2075_v27, %v1821_v28  ;;  %v2136_v30 = vpop.f32.mrb[9].mxu1 }
 0x465   :  { %v1824_v31 = vpop.f32.mrb[10].mxu1 }
 0x466   :  { %v1827_v33 = vmax.f32 %v1822_v29, 0.0  ;;  %v2137_v34 = vpop.f32.mrb[11].mxu1 }
 0x468   :  { %v1835_v35 = vmul.f32 %v2084_v32, %v1827_v33 }
 0x46a   :  { %v1837_v36 = vsel %vm1836_vm3, %v1835_v35, 0.0 }
 0x46b   :  { %1838 = vadd.xlane.f32.xlu0 %v1837_v36 }
 0x4f8   :  { %v1839_v38 = vpop.xlane.xlu0 %1838 }
 0x4f9   :  { %v1847_v39 = vadd.f32 %v2085_v37, %v1839_v38 }
 0x4fb   :  { %v2086_v40 = vmul.f32 -1.442695, %v1847_v39 }
 0x4fd   :  { %2477 = vpow2.f32 %v2086_v40 }
 0x507   :  { %v2478_v41 = vpop.eup %2477 }
 0x508   :  { %v1851_v42 = vadd.f32 1.0, %v2478_v41 }
 0x50a   :  { %2479 = vrcp.f32 %v1851_v42 }
 0x514   :  { %v2480_v43 = vpop.eup %2479 }
 0x515   :  { %1855 = vst.msk [vmem:[%s2753_s11] sm:$0xff] %vm1854_vm4, %v2480_v43 }
 0x516   :  { %1860 = vsyncpa [#allocation4], 1 }
 0x517   :  { %1861 = vsyncpa [#allocation6], 1 }

</bundles_post_ra>
